<compile_context>
chip_gen: v7x
topology: tpu7x:2x2x1
jax: 0.10.0
libtpu: 0.0.40
codegen_flags: <defaults>
</compile_context>

<pallas_src>
import math

import jax
import jax.numpy as jnp
from jax.experimental import pallas as pl
from jax.experimental.pallas import tpu as pltpu


def allocate_subsidy_gradient(grad_norm, epsilon, gamma, decay_value):
    # jnp.maximum so a traced/array grad_norm (e.g. reused inside training) works too;
    # in the pure forward pass grad_norm is 0.0 and this is a compile-time scalar.
    gap = jnp.maximum(0.0, epsilon - grad_norm)
    return gamma * gap * decay_value


def _round_up(n, m):
    return ((n + m - 1) // m) * m


def _make_mlp_kernel(n_layers):
    """Kernel refs: (x, w0, b0, w1, b1, ..., out).

    x block is (TB, d_in); all activations are (D, TB) with the batch on lanes."""
    def kernel(*refs):
        x_ref = refs[0]
        o_ref = refs[-1]
        w0_ref, b0_ref = refs[1], refs[2]
        # First layer: contract d_in of W (d1, d_in) against d_in of x (TB, d_in)
        # -> (d1, TB). The transpose is folded into the matmul lowering (MXU/XLU),
        # not done as a separate HBM pass in the wrapper.
        h = jax.lax.dot_general(
            w0_ref[...], x_ref[...],
            dimension_numbers=(((1,), (1,)), ((), ())),
            preferred_element_type=jnp.float32)
        h = jnp.maximum(h + b0_ref[...], 0.0)          # f32 bias(+subsidy) + ReLU
        for l in range(1, n_layers):
            w_ref = refs[1 + 2 * l]                    # (d_out, d_in), VMEM-resident
            b_ref = refs[2 + 2 * l]                    # (d_out, 1), subsidy pre-folded
            # z overwrites h: only one (D, TB) f32 activation live besides the dot input.
            h = jnp.maximum(
                jnp.dot(w_ref[...], h.astype(w_ref.dtype),
                        preferred_element_type=jnp.float32) + b_ref[...],
                0.0)
        o_ref[...] = h.astype(o_ref.dtype)             # lane-dense store (TB % 128 == 0)
    return kernel


def subsidy_net_forward(x, params, step, *, epsilon=0.05, gamma=1.0, beta=0.01,
                        grad_norm=0.0, mxu_dtype=jnp.bfloat16,
                        out_dtype=jnp.float32, batch_tile=2048,
                        batch_major_output=True):
    """Fused SubsidyNetV2 forward.

    x: (B, d_in) f32.  params: [(W_i, b_i)] with W_i (d_out, d_in) (PyTorch layout)
    and b_i (d_out, 1).  Returns (B, d_out) f32 by default; set
    batch_major_output=False to get (d_out, B) and skip the post-kernel transpose.
    grad_norm defaults to 0.0 (pure forward pass: weight.grad is None).
    On v5e, batch_tile in the 512-1024 range keeps vreg/store pressure lowest.
    """
    decay = math.exp(-beta * step)                     # DecayScheduler('exponential')
    subsidy = allocate_subsidy_gradient(grad_norm, epsilon, gamma, decay)

    B, d_in = x.shape
    d_out = params[-1][0].shape[0]
    n_layers = len(params)

    # Batch tile: as large as the batch allows (amortizes per-grid-step overhead),
    # never padding a small batch past the next multiple of 128.
    TB = min(batch_tile, _round_up(B, 128))
    n_tiles = pl.cdiv(B, TB)
    # If one tile would swallow a big batch, split it so the "parallel" grid axis has
    # >= 2 steps and v7x's second TensorCore gets work (each half still >= 256 cols;
    # on 1-TC chips this just adds one cheap pipeline step).
    if n_tiles == 1 and TB >= 512:
        TB = _round_up(pl.cdiv(B, 2), 128)
        n_tiles = pl.cdiv(B, TB)
    B_pad = n_tiles * TB

    # Batch-major input, zero-padded on the batch dim only (no host-side transpose).
    x_in = x.astype(mxu_dtype)
    if B_pad != B:
        x_in = jnp.zeros((B_pad, d_in), mxu_dtype).at[:B].set(x_in)

    flat = [x_in]
    in_specs = [pl.BlockSpec((TB, d_in), lambda i: (i, 0))]
    for w, b in params:
        flat += [w.astype(mxu_dtype), (b + subsidy).astype(jnp.float32)]
        in_specs += [pl.BlockSpec(w.shape, lambda i: (0, 0)),   # constant block index:
                     pl.BlockSpec(b.shape, lambda i: (0, 0))]   # DMA'd once, stays resident

    out_t = pl.pallas_call(
        _make_mlp_kernel(n_layers),
        out_shape=jax.ShapeDtypeStruct((d_out, B_pad), out_dtype),
        grid_spec=pltpu.PrefetchScalarGridSpec(
            num_scalar_prefetch=0,
            grid=(n_tiles,),
            in_specs=in_specs,
            out_specs=pl.BlockSpec((d_out, TB), lambda i: (0, i))),
        compiler_params=pltpu.CompilerParams(
            dimension_semantics=("parallel",)),
    )(*flat)

    # Padded columns hold relu(bias + subsidy), not zeros -> slice them off before the
    # (optional) transpose so the post-kernel pass touches only real columns.
    out = out_t[:, :B]
    return out.T if batch_major_output else out


def init_params(key, dims):
    """he_normal weights (kaiming_normal, relu) + PyTorch default bias init.

    Weights in PyTorch layout (d_out, d_in); biases as (d_out, 1)."""
    params = []
    for i in range(len(dims) - 1):
        fan_in, fan_out = dims[i], dims[i + 1]
        key, kw, kb = jax.random.split(key, 3)
        std = math.sqrt(2.0 / fan_in)
        w = std * jax.random.normal(kw, (fan_out, fan_in), jnp.float32)
        bound = 1.0 / math.sqrt(fan_in)
        b = jax.random.uniform(kb, (fan_out, 1), jnp.float32, -bound, bound)
        params.append((w, b))
    return params


def reference_forward(x, params, step, *, epsilon=0.05, gamma=1.0, beta=0.01,
                      grad_norm=0.0):
    """Pure-JAX reference matching the PyTorch module (ReLU+subsidy on every layer,
    including the last, exactly as SubsidyLinearV2.forward does)."""
    subsidy = allocate_subsidy_gradient(grad_norm, epsilon, gamma, math.exp(-beta * step))
    h = x
    for w, b in params:
        z = h @ w.T + b.T + subsidy
        h = jnp.maximum(z, 0.0)
    return h


if __name__ == "__main__":
    # SubsidyNetV2(input_dim=16, hidden_dims=[32, 32], output_dim=8), step=5
    dims = [16, 32, 32, 8]
    step = 5

    key = jax.random.PRNGKey(0)
    key, kx = jax.random.split(key)
    params = init_params(key, dims)

    # Small demo batch: B=8 -> one 128-wide tile (clamped, not padded to batch_tile).
    x = jax.random.normal(kx, (8, dims[0]), jnp.float32)
    ref = reference_forward(x, params, step)

    # Default path: bf16 MXU operands, f32 accumulate / bias / ReLU.
    out = jax.block_until_ready(subsidy_net_forward(x, params, step))
    assert out.shape == (8, dims[-1])
    assert jnp.allclose(out, ref, atol=1e-1, rtol=1e-1), "bf16 kernel mismatch vs reference"

    # f32 MXU path: tight comparison against the f32 reference.
    out_f32 = jax.block_until_ready(
        subsidy_net_forward(x, params, step, mxu_dtype=jnp.float32))
    assert jnp.allclose(out_f32, ref, atol=1e-5, rtol=1e-5), "f32 kernel mismatch vs reference"

    # Multi-tile / padded-batch path: B=700 -> 2 tiles of 384 (parallel grid axis spans
    # both v7x cores), batch padded to 768, padded columns sliced off.
    key, kx2 = jax.random.split(key)
    x2 = jax.random.normal(kx2, (700, dims[0]), jnp.float32)
    ref2 = reference_forward(x2, params, step)
    out2 = jax.block_until_ready(
        subsidy_net_forward(x2, params, step, mxu_dtype=jnp.float32))
    assert out2.shape == (700, dims[-1])
    assert jnp.allclose(out2, ref2, atol=1e-5, rtol=1e-5), "tiled kernel mismatch vs reference"

    # (d_out, B) output option: skips the post-kernel transpose entirely.
    out_dmaj = jax.block_until_ready(
        subsidy_net_forward(x, params, step, mxu_dtype=jnp.float32,
                            batch_major_output=False))
    assert out_dmaj.shape == (dims[-1], 8)
    assert jnp.allclose(out_dmaj.T, ref, atol=1e-5, rtol=1e-5)

    print("KERNEL_OK")
</pallas_src>

<mosaic_0001>
module attributes {stable_mosaic.version = 11 : i64} {
  func.func @kernel(%arg0: i32, %arg1: memref<128x16xbf16, #tpu.memory_space<vmem>>, %arg2: memref<32x16xbf16, #tpu.memory_space<vmem>>, %arg3: memref<32x1xf32, #tpu.memory_space<vmem>>, %arg4: memref<32x32xbf16, #tpu.memory_space<vmem>>, %arg5: memref<32x1xf32, #tpu.memory_space<vmem>>, %arg6: memref<8x32xbf16, #tpu.memory_space<vmem>>, %arg7: memref<8x1xf32, #tpu.memory_space<vmem>>, %arg8: memref<8x128xf32, #tpu.memory_space<vmem>>) attributes {dimension_semantics = [#tpu.dimension_semantics<parallel>], iteration_bounds = array<i64: 1>, scalar_prefetch = 0 : i64, scratch_operands = 0 : i64, tpu.core_type = #tpu.core_type<tc>, window_params = [{transform_indices = @transform_0, window_bounds = array<i64: 128, 16>}, {pipeline_mode = #tpu.pipeline_mode<synchronous>, transform_indices = @transform_1, window_bounds = array<i64: 32, 16>}, {pipeline_mode = #tpu.pipeline_mode<synchronous>, transform_indices = @transform_2, window_bounds = array<i64: 32, 1>}, {pipeline_mode = #tpu.pipeline_mode<synchronous>, transform_indices = @transform_3, window_bounds = array<i64: 32, 32>}, {pipeline_mode = #tpu.pipeline_mode<synchronous>, transform_indices = @transform_4, window_bounds = array<i64: 32, 1>}, {pipeline_mode = #tpu.pipeline_mode<synchronous>, transform_indices = @transform_5, window_bounds = array<i64: 8, 32>}, {pipeline_mode = #tpu.pipeline_mode<synchronous>, transform_indices = @transform_6, window_bounds = array<i64: 8, 1>}, {transform_indices = @transform_7, window_bounds = array<i64: 8, 128>}]} {
    %c0 = arith.constant 0 : index
    %c0_0 = arith.constant 0 : index
    %0 = vector.load %arg2[%c0, %c0_0] : memref<32x16xbf16, #tpu.memory_space<vmem>>, vector<32x16xbf16>
    %c0_1 = arith.constant 0 : index
    %c0_2 = arith.constant 0 : index
    %1 = vector.load %arg1[%c0_1, %c0_2] : memref<128x16xbf16, #tpu.memory_space<vmem>>, vector<128x16xbf16>
    %cst = arith.constant dense<0.000000e+00> : vector<32x128xf32>
    %2 = tpu.matmul %0, %1, %cst {dimension_numbers = #tpu.dot_dimension_numbers<[1], [1], [0], [0], [0, 0, 1, 0], [], []>} : vector<32x16xbf16>, vector<128x16xbf16>, vector<32x128xf32> -> vector<32x128xf32>
    %c0_3 = arith.constant 0 : index
    %c0_4 = arith.constant 0 : index
    %3 = vector.load %arg3[%c0_3, %c0_4] : memref<32x1xf32, #tpu.memory_space<vmem>>, vector<32x1xf32>
    %4 = vector.broadcast %3 : vector<32x1xf32> to vector<32x128xf32>
    %5 = arith.addf %2, %4 : vector<32x128xf32>
    %cst_5 = arith.constant 0.000000e+00 : f32
    %6 = vector.broadcast %cst_5 : f32 to vector<32x128xf32>
    %7 = arith.maximumf %5, %6 : vector<32x128xf32>
    %c0_6 = arith.constant 0 : index
    %c0_7 = arith.constant 0 : index
    %8 = vector.load %arg4[%c0_6, %c0_7] : memref<32x32xbf16, #tpu.memory_space<vmem>>, vector<32x32xbf16>
    %9 = arith.truncf %7 : vector<32x128xf32> to vector<32x128xbf16>
    %cst_8 = arith.constant dense<0.000000e+00> : vector<32x128xf32>
    %10 = tpu.matmul %8, %9, %cst_8 {dimension_numbers = #tpu.dot_dimension_numbers<[1], [0], [0], [1], [0, 0, 1, 1], [], []>} : vector<32x32xbf16>, vector<32x128xbf16>, vector<32x128xf32> -> vector<32x128xf32>
    %c0_9 = arith.constant 0 : index
    %c0_10 = arith.constant 0 : index
    %11 = vector.load %arg5[%c0_9, %c0_10] : memref<32x1xf32, #tpu.memory_space<vmem>>, vector<32x1xf32>
    %12 = vector.broadcast %11 : vector<32x1xf32> to vector<32x128xf32>
    %13 = arith.addf %10, %12 : vector<32x128xf32>
    %cst_11 = arith.constant 0.000000e+00 : f32
    %14 = vector.broadcast %cst_11 : f32 to vector<32x128xf32>
    %15 = arith.maximumf %13, %14 : vector<32x128xf32>
    %c0_12 = arith.constant 0 : index
    %c0_13 = arith.constant 0 : index
    %16 = vector.load %arg6[%c0_12, %c0_13] : memref<8x32xbf16, #tpu.memory_space<vmem>>, vector<8x32xbf16>
    %17 = arith.truncf %15 : vector<32x128xf32> to vector<32x128xbf16>
    %cst_14 = arith.constant dense<0.000000e+00> : vector<8x128xf32>
    %18 = tpu.matmul %16, %17, %cst_14 {dimension_numbers = #tpu.dot_dimension_numbers<[1], [0], [0], [1], [0, 0, 1, 1], [], []>} : vector<8x32xbf16>, vector<32x128xbf16>, vector<8x128xf32> -> vector<8x128xf32>
    %c0_15 = arith.constant 0 : index
    %c0_16 = arith.constant 0 : index
    %19 = vector.load %arg7[%c0_15, %c0_16] : memref<8x1xf32, #tpu.memory_space<vmem>>, vector<8x1xf32>
    %20 = vector.broadcast %19 : vector<8x1xf32> to vector<8x128xf32>
    %21 = arith.addf %18, %20 : vector<8x128xf32>
    %cst_17 = arith.constant 0.000000e+00 : f32
    %22 = vector.broadcast %cst_17 : f32 to vector<8x128xf32>
    %23 = arith.maximumf %21, %22 : vector<8x128xf32>
    %c0_18 = arith.constant 0 : index
    %c0_19 = arith.constant 0 : index
    %24 = vector.load %arg8[%c0_18, %c0_19] : memref<8x128xf32, #tpu.memory_space<vmem>>, vector<8x128xf32>
    tpu.vector_store %arg8[%c0_18, %c0_19], %23 {strides = array<i32>} : memref<8x128xf32, #tpu.memory_space<vmem>>, vector<8x128xf32>,
    return
  }
  func.func @transform_0(%arg0: i32) -> (i32, i32) {
    %c0_i32 = arith.constant 0 : i32
    %c0_i32_0 = arith.constant 0 : i32
    return %arg0, %c0_i32 : i32, i32
  }
  func.func @transform_1(%arg0: i32) -> (i32, i32) {
    %c0_i32 = arith.constant 0 : i32
    %c0_i32_0 = arith.constant 0 : i32
    %c0_i32_1 = arith.constant 0 : i32
    return %c0_i32, %c0_i32_0 : i32, i32
  }
  func.func @transform_2(%arg0: i32) -> (i32, i32) {
    %c0_i32 = arith.constant 0 : i32
    %c0_i32_0 = arith.constant 0 : i32
    %c0_i32_1 = arith.constant 0 : i32
    return %c0_i32, %c0_i32_0 : i32, i32
  }
  func.func @transform_3(%arg0: i32) -> (i32, i32) {
    %c0_i32 = arith.constant 0 : i32
    %c0_i32_0 = arith.constant 0 : i32
    %c0_i32_1 = arith.constant 0 : i32
    return %c0_i32, %c0_i32_0 : i32, i32
  }
  func.func @transform_4(%arg0: i32) -> (i32, i32) {
    %c0_i32 = arith.constant 0 : i32
    %c0_i32_0 = arith.constant 0 : i32
    %c0_i32_1 = arith.constant 0 : i32
    return %c0_i32, %c0_i32_0 : i32, i32
  }
  func.func @transform_5(%arg0: i32) -> (i32, i32) {
    %c0_i32 = arith.constant 0 : i32
    %c0_i32_0 = arith.constant 0 : i32
    %c0_i32_1 = arith.constant 0 : i32
    return %c0_i32, %c0_i32_0 : i32, i32
  }
  func.func @transform_6(%arg0: i32) -> (i32, i32) {
    %c0_i32 = arith.constant 0 : i32
    %c0_i32_0 = arith.constant 0 : i32
    %c0_i32_1 = arith.constant 0 : i32
    return %c0_i32, %c0_i32_0 : i32, i32
  }
  func.func @transform_7(%arg0: i32) -> (i32, i32) {
    %c0_i32 = arith.constant 0 : i32
    %c0_i32_0 = arith.constant 0 : i32
    return %c0_i32, %arg0 : i32, i32
  }
}

</mosaic_0001>

<bundles_post_ra>
// kernel: tpu_custom_call.1
= control target key start
LH: loop header
LB: loop body
LE: loop exit
PB: predicated region body
PF: predicated region fallthrough
CT: control target
= control target key end

     0   :  { %vm122_vm0 = vcmask 130048   ;;  %v494_v3 = vmov 0   ;;  %s637_s0 = inlined_call_operand.vmem [shape: bf16[128,16], index: 0, kind: input, shape index: {}]   ;;  %s638_s1 = inlined_call_operand.vmem [shape: bf16[32,16], index: 1, kind: input, shape index: {}]   ;;  %s639_s2 = inlined_call_operand.vmem [shape: f32[32,1], index: 2, kind: input, shape index: {}]   ;;  %s640_s3 = inlined_call_operand.vmem [shape: bf16[32,32], index: 3, kind: input, shape index: {}]   ;;  %s641_s4 = inlined_call_operand.vmem [shape: f32[32,1], index: 4, kind: input, shape index: {}]   ;;  %s642_s5 = inlined_call_operand.vmem [shape: bf16[8,32], index: 5, kind: input, shape index: {}]   ;;  %s643_s6 = inlined_call_operand.vmem [shape: f32[8,1], index: 6, kind: input, shape index: {}]   ;;  %s644_s7 = inlined_call_operand.hbm [shape: f32[8,128], index: 7, kind: output, shape index: {}]  }
   0x1   :  { %v458_v0 = vld [vmem:[%s637_s0] sm:$0xff]   ;;  %v459_v1 = vld [vmem:[%s637_s0 + $0x8] sm:$0xff]   ;;  %456 = vset.pattern.permute.xlu0 %v494_v3  ;;  %457 = vset.pattern.permute.xlu1 %v494_v3  ;;  %v460_v4 = vld [vmem:[%s637_s0 + $0x10] sm:$0xff]  }
   0x2   :  { %444 = vmatprep.subr.msk.bf16.mxu0 %vm122_vm0, %v458_v0  ;;  %v130_v2 = vsel %vm122_vm0, %v458_v0, 0  ;;  %v133_v5 = vsel %vm122_vm0, %v459_v1, 0  ;;  %v466_v6 = vld [vmem:[%s638_s1] sm:$0xff]   ;;  %v50_v8 = vld [vmem:[%s639_s2 + $0x10] sm:$0xff]  ;;  %v49_v9 = vld [vmem:[%s639_s2 + $0x8] sm:$0xff] }
   0x3   :  { %409 = vmatpush3.bf16.xpose.msra.mxu0 %v130_v2  ;;  %424 = vmatprep.mubr.msk.bf16.mxu0 %vm122_vm0, %v466_v6  ;;  %v48_v7 = vld [vmem:[%s639_s2] sm:$0xff]  ;;  %v51_v10 = vld [vmem:[%s639_s2 + $0x18] sm:$0xff] }
   0x4   :  { %445 = vmatprep.subr.msk.bf16.mxu0 %vm122_vm0, %v459_v1  ;;  %54 = vperm.xlu0 %456, %v48_v7  }
   0x5   :  { %64 = vperm.xlu1 %457, %v50_v8  }
   0xb   :  { %411 = vmatpush3.bf16.xpose.msra.mxu0 %v133_v5 }
   0xc   :  { %446 = vmatprep.subr.msk.bf16.mxu0 %vm122_vm0, %v460_v4 }
   0xd   :  { %12 = vsyncpa [#allocation3], 0  ;;  %59 = vperm.xlu0 %456, %v49_v9   ;;  %v136_v11 = vsel %vm122_vm0, %v460_v4, 0  ;;  %v461_v12 = vld [vmem:[%s637_s0 + $0x18] sm:$0xff]   ;;  %v212_v13 = vld [vmem:[%s641_s4] sm:$0xff]  ;;  %69 = vperm.xlu1 %457, %v51_v10   ;;  %vm246_vm1 = vcmask 261120  }
   0xe   :  { %v213_v14 = vld [vmem:[%s641_s4 + $0x8] sm:$0xff]  ;;  %v214_v15 = vld [vmem:[%s641_s4 + $0x10] sm:$0xff]  ;;  %v215_v16 = vld [vmem:[%s641_s4 + $0x18] sm:$0xff]  ;;  %v139_v17 = vsel %vm122_vm0, %v461_v12, 0  ;;  %v495_v48 = vmov 0.0   ;;  %vm496_vm2 = vmmov 0  }
   0xf   :  { %v462_v18 = vld [vmem:[%s637_s0 + $0x20] sm:$0xff]   ;;  %v463_v21 = vld [vmem:[%s637_s0 + $0x28] sm:$0xff]   ;;  %v464_v23 = vld [vmem:[%s637_s0 + $0x30] sm:$0xff]   ;;  %s497_s16 = smov [#allocation2]  }
  0x10   :  { %v309_v19 = vld [vmem:[%s643_s6] sm:$0xff]  ;;  %v142_v20 = vsel %vm122_vm0, %v462_v18, 0  ;;  %v145_v22 = vsel %vm122_vm0, %v463_v21, 0  ;;  %v148_v24 = vsel %vm122_vm0, %v464_v23, 0  ;;  %v465_v25 = vld [vmem:[%s637_s0 + $0x38] sm:$0xff]   ;;  %v467_v27 = vld [vmem:[%s638_s1 + $0x8] sm:$0xff]  }
  0x11   :  { %218 = vperm.xlu0 %456, %v212_v13   ;;  %223 = vperm.xlu1 %457, %v213_v14   ;;  %v151_v26 = vsel %vm122_vm0, %v465_v25, 0  ;;  %v468_v28 = vld [vmem:[%s640_s3] sm:$0xff]   ;;  %v469_v47 = vld [vmem:[%s640_s3 + $0x8] sm:$0xff]   ;;  %s366_s17 = sshll.u32 %s497_s16, 4  ;;  %s367_s17 = int_to_ptr.vmem [resolvable:$true] %s366_s17 }
  0x12   :  { %432 = vmatprep.mubr.msk.bf16.mxu1 %vm246_vm1, %v468_v28  ;;  %v306_v3 = vld [vmem:[%s642_s5] sm:$0xf]  ;;  %s470_s18 = scalar_lea.vmem %s367_s17, 128  ;;  %p475_p1 = scmp.lt.s32.totalorder %s367_s17, %s367_s17 }
  0x13   :  { %413 = vmatpush3.bf16.xpose.msra.mxu0 %v136_v11  ;;  %p471_p0 = scmp.ne.s32.totalorder %s367_s17, %s470_s18  ;;  %p476_p2 = scmp.lt.s32.totalorder %s470_s18, %s470_s18 }
  0x14   :  { %447 = vmatprep.subr.msk.bf16.mxu0 %vm122_vm0, %v461_v12 }
  0x15   :  { %228 = vperm.xlu0 %456, %v214_v15   ;;  %233 = vperm.xlu1 %457, %v215_v16   ;;  %p477_p3 = por %p476_p2, %p475_p1 }
  0x17   :  { %p478_p4 = pnand %p477_p3, %p471_p0 }
  0x19   :  { %312 = vperm.xlu0 %456, %v309_v19  }
  0x1b   :  { %415 = vmatpush3.bf16.xpose.msra.mxu0 %v139_v17 }
  0x1c   :  { %448 = vmatprep.subr.msk.bf16.mxu0 %vm122_vm0, %v462_v18 }
  0x23   :  { %417 = vmatpush3.bf16.xpose.msra.mxu0 %v142_v20 }
  0x24   :  { %449 = vmatprep.subr.msk.bf16.mxu0 %vm122_vm0, %v463_v21 }
  0x2b   :  { %419 = vmatpush3.bf16.xpose.msra.mxu0 %v145_v22 }
  0x2c   :  { %450 = vmatprep.subr.msk.bf16.mxu0 %vm122_vm0, %v464_v23 }
  0x33   :  { %421 = vmatpush3.bf16.xpose.msra.mxu0 %v148_v24 }
  0x34   :  { %451 = vmatprep.subr.msk.bf16.mxu0 %vm122_vm0, %v465_v25 }
  0x3b   :  { %423 = vmatpush3.bf16.xpose.msra.mxu0 %v151_v26 }
  0x42   :  { %425 = vmatmul.mubr.msk.bf16.vlgmr.msra.gmra.mrb[0].mxu0 %vm122_vm0, %v467_v27 }
  0x83   :  { %v55_v30 = vpop.permute.xlu0 %54 }
  0x84   :  { %v65_v29 = vpop.permute.xlu1 %64 }
  0x8c   :  { %v70_v34 = vpop.permute.xlu1 %69  ;;  %v60_v37 = vpop.permute.xlu0 %59 }
  0x90   :  { %v219_v49 = vpop.permute.xlu0 %218  ;;  %v224_v50 = vpop.permute.xlu1 %223 }
  0x94   :  { %v229_v51 = vpop.permute.xlu0 %228  ;;  %v234_v55 = vpop.permute.xlu1 %233 }
  0x98   :  { %v313_v4 = vpop.permute.xlu0 %312 }
 0x115   :  { %v426_v31 = vpop.f32.mrb[0].mxu0 }
 0x116   :  { %v196_v32 = vadd.f32 %v426_v31, %v65_v29  ;;  %v187_v33 = vpop.f32.mrb[1].mxu0 }
 0x117   :  { %v188_v35 = vadd.f32 %v187_v33, %v55_v30  ;;  %v427_v36 = vpop.f32.mrb[2].mxu0 }
 0x118   :  { %v199_v38 = vadd.f32 %v427_v36, %v70_v34  ;;  %v190_v39 = vpop.f32.mrb[3].mxu0  ;;  %v204_v41 = vmax.f32 %v196_v32, 0.0 }
 0x119   :  { %v191_v40 = vadd.f32 %v190_v39, %v60_v37  ;;  %v202_v43 = vmax.f32 %v188_v35, 0.0 }
 0x11a   :  { %v205_v42 = vmax.f32 %v199_v38, 0.0 }
 0x11b   :  { %v203_v44 = vmax.f32 %v191_v40, 0.0 }
 0x11c   :  { %v211_v45 = vpack.c.bf16 %v205_v42, %v204_v41 }
 0x11d   :  { %v210_v46 = vpack.c.bf16 %v203_v44, %v202_v43 }
 0x11f   :  { %428 = vmatprep.subr.bf16.mxu1 %v210_v46 }
 0x120   :  { %429 = vmatpush3.bf16.msra.mxu1 %v210_v46 }
 0x121   :  { %430 = vmatprep.subr.bf16.mxu1 %v211_v45 }
 0x124   :  { %431 = vmatpush3.bf16.msra.mxu1 %v211_v45 }
 0x125   :  { %436 = vmatprep.subr.bf16.mxu1 %v495_v48 }
 0x127   :  { %433 = vmatmul.mubr.msk.bf16.vlgmr.msra.gmra.mrb[0].mxu1 %vm246_vm1, %v469_v47 }
 0x128   :  { %440 = vmatprep.mubr.msk.bf16.mxu1 %vm496_vm2, %v495_v48 }
 0x1fa   :  { %v434_v52 = vpop.f32.mrb[0].mxu1 }
 0x1fb   :  { %v296_v53 = vadd.f32 %v434_v52, %v229_v51  ;;  %v287_v54 = vpop.f32.mrb[1].mxu1 }
 0x1fc   :  { %v288_v56 = vadd.f32 %v287_v54, %v219_v49  ;;  %v435_v57 = vpop.f32.mrb[2].mxu1 }
 0x1fd   :  { %v299_v58 = vadd.f32 %v435_v57, %v234_v55  ;;  %v290_v59 = vpop.f32.mrb[3].mxu1  ;;  %v304_v61 = vmax.f32 %v296_v53, 0.0 }
 0x1fe   :  { %v291_v60 = vadd.f32 %v290_v59, %v224_v50  ;;  %v302_v63 = vmax.f32 %v288_v56, 0.0 }
 0x1ff   :  { %v305_v62 = vmax.f32 %v299_v58, 0.0 }
 0x200   :  { %v303_v0 = vmax.f32 %v291_v60, 0.0 }
 0x201   :  { %v308_v1 = vpack.c.bf16 %v305_v62, %v304_v61 }
 0x202   :  { %v307_v2 = vpack.c.bf16 %v303_v0, %v302_v63 }
 0x204   :  { %437 = vmatpush3.bf16.msra.mxu1 %v307_v2 }
 0x205   :  { %438 = vmatprep.subr.bf16.mxu1 %v495_v48 }
 0x208   :  { %439 = vmatpush3.bf16.msra.mxu1 %v308_v1 }
 0x20b   :  { %441 = vmatmul.mubr.msk.bf16.vlgmr.msra.gmra.mrb[4].mxu1 %vm246_vm1, %v306_v3 }
 0x2de   :  { %v352_v5 = vpop.f32.mrb[4].mxu1 }
 0x2df   :  { %v353_v6 = vadd.f32 %v352_v5, %v313_v4  ;;  %v442_v7 = vpop.f32.mrb[5].mxu1 }
 0x2e0   :  { %v355_v8 = vpop.f32.mrb[6].mxu1 }
 0x2e1   :  { %v358_v9 = vmax.f32 %v353_v6, 0.0  ;;  %v443_v10 = vpop.f32.mrb[7].mxu1 }
 0x2e3   :  { %359 = vst [vmem:[#allocation2] sm:$0xff] %v358_v9 }
 0x2e4   :  { %481 = shalt.err (!%p478_p4)
}
 0x2e5   :  { %s482_s20 = scalar_lea.hbm %s644_s7, 128 }
 0x2e6   :  { %p483_p5 = scmp.ne.s32.totalorder %s644_s7, %s482_s20  ;;  %p486_p6 = scmp.lt.u32.totalorder %s482_s20, %s644_s7 }
 0x2e8   :  { %p488_p7 = pnand %p486_p6, %p483_p5 }
 0x2ea   :  { %491 = shalt.err (!%p488_p7)
}
 0x2eb   :  { %369 = dma.vmem_to_hbm [thread:$0]  %s367_s17, 128, %s644_s7, [#allocation3]  }
 0x2ec   :  { %492 = dma.done.wait [#allocation3], 128  }
 0x2ed   :  { %493 = vsyncadd [#allocation3], 4294967168 }
 0x2ee   :  { %373 = vsyncpa [#allocation3], 1 }

</bundles_post_ra>
